<compile_context>
chip_gen: v6e
topology: v6e:2x2x1
jax: 0.10.0
libtpu: 0.0.40
codegen_flags: <defaults>
</compile_context>

<pallas_src>
import jax
import jax.numpy as jnp
from jax.experimental import pallas as pl
from jax.experimental.pallas import tpu as pltpu


# ---------------------------------------------------------------------------
# Kernel
# ---------------------------------------------------------------------------

def _pick_rows(p, q):
    """Sublane chunk height: keep each live (rows, q) array at ~4 vregs."""
    if p % 8 != 0:
        return p                      # tiny / full-extent tile
    target = max(4096 // q, 8)
    for cand in (32, 16, 8):
        if cand <= target and p % cand == 0:
            return cand
    return 8


def _spatial_weights_kernel(x1_ref, x2_ref, w1a_ref, w1b_ref, b1_ref,
                            w2_ref, b2_ref, o_ref):
    # x1_ref, x2_ref : (1, dim, P, Q) f32 VMEM  -- pixel tile, channels on axis 1
    # w1a_ref        : (hid*dim,)     f32 SMEM  -- conv1 weights, x1 half
    # w1b_ref        : (hid*dim,)     f32 SMEM  -- conv1 weights, x2 half
    # b1_ref         : (hid,)         f32 SMEM
    # w2_ref         : (2*hid,)       f32 SMEM  -- conv2 weights
    # b2_ref         : (2,)           f32 SMEM
    # o_ref          : (2, 1, P, Q)   f32 VMEM  -- channel-major, lane-dense output
    dim = x1_ref.shape[1]
    hid = b1_ref.shape[0]
    p = x1_ref.shape[2]
    q = x1_ref.shape[3]

    rows = _pick_rows(p, q)
    n_chunks = p // rows

    # Hoist every SMEM parameter read out of the pixel-chunk loop (read once).
    w1a = [w1a_ref[i] for i in range(hid * dim)]
    w1b = [w1b_ref[i] for i in range(hid * dim)]
    b1 = [b1_ref[k] for k in range(hid)]
    w2 = [w2_ref[i] for i in range(2 * hid)]
    b2 = [b2_ref[j] for j in range(2)]

    def chunk(r0):
        sl = pl.ds(r0, rows)
        # Layer 1: hidden_k = relu(sum_c w1[k,c] * x_cat[c] + b1[k])   (VPU FMAs)
        hidden = []
        for k in range(hid):
            acc = x1_ref[0, 0, sl, :] * w1a[k * dim] + b1[k]   # bias folded in
            for c in range(1, dim):
                acc = acc + x1_ref[0, c, sl, :] * w1a[k * dim + c]
            for c in range(dim):
                acc = acc + x2_ref[0, c, sl, :] * w1b[k * dim + c]
            hidden.append(jnp.maximum(acc, 0.0))
        # Layer 2: y_j = sigmoid(sum_k w2[j,k] * hidden_k + b2[j])
        for j in range(2):
            y = hidden[0] * w2[j * hid] + b2[j]
            for k in range(1, hid):
                y = y + hidden[k] * w2[j * hid + k]
            # sigmoid(y) == 0.5 * tanh(0.5*y) + 0.5  -> tanh on EUP, no VALU divide.
            o_ref[j, 0, sl, :] = (0.5 * jnp.tanh(0.5 * y) + 0.5).astype(o_ref.dtype)

    if n_chunks == 1:
        chunk(0)
    elif n_chunks <= 8:
        @pl.loop(0, n_chunks, unroll=True)
        def _(i):
            chunk(pl.multiple_of(i * rows, rows))
    else:
        @pl.loop(0, n_chunks)
        def _(i):
            chunk(pl.multiple_of(i * rows, rows))


# ---------------------------------------------------------------------------
# Tiling / VMEM sizing
# ---------------------------------------------------------------------------

def _vmem_info():
    """(physical VMEM bytes, working-set byte budget) for the local TPU gen."""
    try:
        cap = int(pltpu.get_tpu_info().vmem_capacity_bytes)
    except Exception:
        cap = 64 << 20                 # v7x has the smallest VMEM; be conservative
    budget = max(min(cap // 4, 24 << 20), 2 << 20)
    return cap, budget


def _choose_tiling(H, W, dim, B, budget_bytes):
    """Pick (Q lanes, R rows, P rows/tile): H*W == R*Q, P | R, biggest tile in budget."""
    hw = H * W
    # Double-buffered working set per pixel: 2 inputs x 2 bufs x dim x 4B + out 2ch x 2 x 4B.
    bytes_per_pixel = 16 * dim + 16
    max_pixels = max(budget_bytes // bytes_per_pixel, 1)

    def p_candidates(r):
        cands = [d for d in range(8, r + 1, 8) if r % d == 0]
        return cands if cands else [r]        # full-extent second-last dim is legal

    options = []
    lane_qs = [q for q in (512, 256, 128) if hw % q == 0]
    if lane_qs:
        for q in lane_qs:
            r = hw // q
            for p in p_candidates(r):
                options.append((q, r, p))
    else:
        # H*W not a multiple of 128: keep native (H, W); full-extent last dim stays
        # sublane/lane-dense and keeps block sizes bounded (no giant single block).
        for p in p_candidates(H):
            options.append((W, H, p))

    feasible = [o for o in options if o[2] * o[0] <= max_pixels]
    if feasible:
        # Prefer >=2 total grid steps (megacore), then biggest tile, then wide lanes.
        return max(feasible,
                   key=lambda o: (B * (o[1] // o[2]) >= 2, o[2] * o[0], o[0]))
    # Nothing fits the budget: minimize the working set; caller raises vmem_limit.
    return min(options, key=lambda o: o[2] * o[0])


# ---------------------------------------------------------------------------
# Wrapper
# ---------------------------------------------------------------------------

@jax.jit
def spatial_weights(x1, x2, w1, b1, w2, b2):
    """Pallas TPU implementation of SpatialWeights.forward.

    x1, x2 : (B, dim, H, W) float32, NCHW (PyTorch layout)
    w1     : (hid, 2*dim) conv1 1x1 weight (out, in),  b1: (hid,)
    w2     : (2, hid)     conv2 1x1 weight (out, in),  b2: (2,)
    returns: (2, B, 1, H, W) float32
    """
    B, dim, H, W = x1.shape
    cap_bytes, budget = _vmem_info()
    q, r, p = _choose_tiling(H, W, dim, B, budget)

    # Free reshapes: keep native NCHW memory layout, view H*W as (R, Q).
    x1r = x1.reshape(B, dim, r, q)
    x2r = x2.reshape(B, dim, r, q)

    # Split conv1 weight into x1-half / x2-half; flatten everything for SMEM.
    w1a = w1[:, :dim].reshape(-1).astype(jnp.float32)
    w1b = w1[:, dim:].reshape(-1).astype(jnp.float32)
    w2f = w2.reshape(-1).astype(jnp.float32)
    b1f = b1.astype(jnp.float32)
    b2f = b2.astype(jnp.float32)

    # Generation-aware VMEM limit: cover the double-buffered working set plus headroom,
    # never exceeding the physical capacity of this chip.
    work_bytes = (16 * dim + 16) * p * q
    vmem_limit = int(min(max(work_bytes + (8 << 20), 32 << 20), cap_bytes))

    smem = pl.BlockSpec(memory_space=pltpu.MemorySpace.SMEM)
    grid = (B, r // p)

    out = pl.pallas_call(
        _spatial_weights_kernel,
        out_shape=jax.ShapeDtypeStruct((2, B, r, q), jnp.float32),
        grid_spec=pltpu.PrefetchScalarGridSpec(
            num_scalar_prefetch=0,
            grid=grid,
            in_specs=[
                pl.BlockSpec((1, dim, p, q), lambda b, t: (b, 0, t, 0)),  # x1 tile
                pl.BlockSpec((1, dim, p, q), lambda b, t: (b, 0, t, 0)),  # x2 tile
                smem, smem, smem, smem, smem,                             # params
            ],
            # Channel-major output block: no post-kernel transpose needed.
            out_specs=pl.BlockSpec((2, 1, p, q), lambda b, t: (0, b, t, 0)),
        ),
        compiler_params=pltpu.CompilerParams(
            dimension_semantics=("parallel", "parallel"),
            vmem_limit_bytes=vmem_limit,
        ),
    )(x1r, x2r, w1a, w1b, b1f, w2f, b2f)

    # Free reshape: (2, B, R, Q) -> (2, B, 1, H, W).
    return out.reshape(2, B, 1, H, W)


# ---------------------------------------------------------------------------
# Reference & demo
# ---------------------------------------------------------------------------

def _reference(x1, x2, w1, b1, w2, b2):
    """Pure-JAX reference of the PyTorch forward for verification."""
    B, _, H, W = x1.shape
    x = jnp.concatenate([x1, x2], axis=1)                   # (B, 2*dim, H, W)
    xh = jnp.transpose(x, (0, 2, 3, 1))                     # (B, H, W, 2*dim)
    h = jnp.maximum(xh @ w1.T + b1, 0.0)                    # (B, H, W, hid)
    y = jax.nn.sigmoid(h @ w2.T + b2)                       # (B, H, W, 2)
    y = jnp.transpose(y, (0, 3, 1, 2)).reshape(B, 2, 1, H, W)
    return jnp.transpose(y, (1, 0, 2, 3, 4))                # (2, B, 1, H, W)


if __name__ == "__main__":
    key = jax.random.PRNGKey(0)
    B, dim, H, W = 2, 4, 16, 16
    reduction = 1
    hid = dim // reduction
    cin = 2 * dim

    k1, k2, k3, k4, k5, k6 = jax.random.split(key, 6)
    x1 = jax.random.normal(k1, (B, dim, H, W), dtype=jnp.float32)
    x2 = jax.random.normal(k2, (B, dim, H, W), dtype=jnp.float32)

    # Deterministic parameter init (conv-style layout: (out, in)).
    w1 = jax.random.normal(k3, (hid, cin), dtype=jnp.float32) / jnp.sqrt(cin)
    b1 = jax.random.normal(k4, (hid,), dtype=jnp.float32) * 0.01
    w2 = jax.random.normal(k5, (2, hid), dtype=jnp.float32) / jnp.sqrt(hid)
    b2 = jax.random.normal(k6, (2,), dtype=jnp.float32) * 0.01

    out = spatial_weights(x1, x2, w1, b1, w2, b2)
    out = jax.block_until_ready(out)

    ref = _reference(x1, x2, w1, b1, w2, b2)
    assert out.shape == (2, B, 1, H, W), out.shape
    err = float(jnp.max(jnp.abs(out - ref)))
    assert err < 5e-5, err

    print("KERNEL_OK")
</pallas_src>

<mosaic_0001>
module attributes {stable_mosaic.version = 11 : i64} {
  func.func @_spatial_weights_kernel(%arg0: i32, %arg1: i32, %arg2: memref<1x4x1x256xf32, #tpu.memory_space<vmem>>, %arg3: memref<1x4x1x256xf32, #tpu.memory_space<vmem>>, %arg4: memref<16xf32, #tpu.memory_space<smem>>, %arg5: memref<16xf32, #tpu.memory_space<smem>>, %arg6: memref<4xf32, #tpu.memory_space<smem>>, %arg7: memref<8xf32, #tpu.memory_space<smem>>, %arg8: memref<2xf32, #tpu.memory_space<smem>>, %arg9: memref<2x1x1x256xf32, #tpu.memory_space<vmem>>) attributes {dimension_semantics = [#tpu.dimension_semantics<parallel>, #tpu.dimension_semantics<parallel>], iteration_bounds = array<i64: 2, 1>, scalar_prefetch = 0 : i64, scratch_operands = 0 : i64, tpu.core_type = #tpu.core_type<tc>, window_params = [{transform_indices = @transform_0, window_bounds = array<i64: 1, 4, 1, 256>}, {transform_indices = @transform_1, window_bounds = array<i64: 1, 4, 1, 256>}, {transform_indices = @transform_2, window_bounds = array<i64: 16>}, {transform_indices = @transform_3, window_bounds = array<i64: 16>}, {transform_indices = @transform_4, window_bounds = array<i64: 4>}, {transform_indices = @transform_5, window_bounds = array<i64: 8>}, {transform_indices = @transform_6, window_bounds = array<i64: 2>}, {transform_indices = @transform_7, window_bounds = array<i64: 2, 1, 1, 256>}]} {
    %c0 = arith.constant 0 : index
    %0 = memref.load %arg4[%c0] : memref<16xf32, #tpu.memory_space<smem>>
    %c1 = arith.constant 1 : index
    %1 = memref.load %arg4[%c1] : memref<16xf32, #tpu.memory_space<smem>>
    %c2 = arith.constant 2 : index
    %2 = memref.load %arg4[%c2] : memref<16xf32, #tpu.memory_space<smem>>
    %c3 = arith.constant 3 : index
    %3 = memref.load %arg4[%c3] : memref<16xf32, #tpu.memory_space<smem>>
    %c4 = arith.constant 4 : index
    %4 = memref.load %arg4[%c4] : memref<16xf32, #tpu.memory_space<smem>>
    %c5 = arith.constant 5 : index
    %5 = memref.load %arg4[%c5] : memref<16xf32, #tpu.memory_space<smem>>
    %c6 = arith.constant 6 : index
    %6 = memref.load %arg4[%c6] : memref<16xf32, #tpu.memory_space<smem>>
    %c7 = arith.constant 7 : index
    %7 = memref.load %arg4[%c7] : memref<16xf32, #tpu.memory_space<smem>>
    %c8 = arith.constant 8 : index
    %8 = memref.load %arg4[%c8] : memref<16xf32, #tpu.memory_space<smem>>
    %c9 = arith.constant 9 : index
    %9 = memref.load %arg4[%c9] : memref<16xf32, #tpu.memory_space<smem>>
    %c10 = arith.constant 10 : index
    %10 = memref.load %arg4[%c10] : memref<16xf32, #tpu.memory_space<smem>>
    %c11 = arith.constant 11 : index
    %11 = memref.load %arg4[%c11] : memref<16xf32, #tpu.memory_space<smem>>
    %c12 = arith.constant 12 : index
    %12 = memref.load %arg4[%c12] : memref<16xf32, #tpu.memory_space<smem>>
    %c13 = arith.constant 13 : index
    %13 = memref.load %arg4[%c13] : memref<16xf32, #tpu.memory_space<smem>>
    %c14 = arith.constant 14 : index
    %14 = memref.load %arg4[%c14] : memref<16xf32, #tpu.memory_space<smem>>
    %c15 = arith.constant 15 : index
    %15 = memref.load %arg4[%c15] : memref<16xf32, #tpu.memory_space<smem>>
    %c0_0 = arith.constant 0 : index
    %16 = memref.load %arg5[%c0_0] : memref<16xf32, #tpu.memory_space<smem>>
    %c1_1 = arith.constant 1 : index
    %17 = memref.load %arg5[%c1_1] : memref<16xf32, #tpu.memory_space<smem>>
    %c2_2 = arith.constant 2 : index
    %18 = memref.load %arg5[%c2_2] : memref<16xf32, #tpu.memory_space<smem>>
    %c3_3 = arith.constant 3 : index
    %19 = memref.load %arg5[%c3_3] : memref<16xf32, #tpu.memory_space<smem>>
    %c4_4 = arith.constant 4 : index
    %20 = memref.load %arg5[%c4_4] : memref<16xf32, #tpu.memory_space<smem>>
    %c5_5 = arith.constant 5 : index
    %21 = memref.load %arg5[%c5_5] : memref<16xf32, #tpu.memory_space<smem>>
    %c6_6 = arith.constant 6 : index
    %22 = memref.load %arg5[%c6_6] : memref<16xf32, #tpu.memory_space<smem>>
    %c7_7 = arith.constant 7 : index
    %23 = memref.load %arg5[%c7_7] : memref<16xf32, #tpu.memory_space<smem>>
    %c8_8 = arith.constant 8 : index
    %24 = memref.load %arg5[%c8_8] : memref<16xf32, #tpu.memory_space<smem>>
    %c9_9 = arith.constant 9 : index
    %25 = memref.load %arg5[%c9_9] : memref<16xf32, #tpu.memory_space<smem>>
    %c10_10 = arith.constant 10 : index
    %26 = memref.load %arg5[%c10_10] : memref<16xf32, #tpu.memory_space<smem>>
    %c11_11 = arith.constant 11 : index
    %27 = memref.load %arg5[%c11_11] : memref<16xf32, #tpu.memory_space<smem>>
    %c12_12 = arith.constant 12 : index
    %28 = memref.load %arg5[%c12_12] : memref<16xf32, #tpu.memory_space<smem>>
    %c13_13 = arith.constant 13 : index
    %29 = memref.load %arg5[%c13_13] : memref<16xf32, #tpu.memory_space<smem>>
    %c14_14 = arith.constant 14 : index
    %30 = memref.load %arg5[%c14_14] : memref<16xf32, #tpu.memory_space<smem>>
    %c15_15 = arith.constant 15 : index
    %31 = memref.load %arg5[%c15_15] : memref<16xf32, #tpu.memory_space<smem>>
    %c0_16 = arith.constant 0 : index
    %32 = memref.load %arg6[%c0_16] : memref<4xf32, #tpu.memory_space<smem>>
    %c1_17 = arith.constant 1 : index
    %33 = memref.load %arg6[%c1_17] : memref<4xf32, #tpu.memory_space<smem>>
    %c2_18 = arith.constant 2 : index
    %34 = memref.load %arg6[%c2_18] : memref<4xf32, #tpu.memory_space<smem>>
    %c3_19 = arith.constant 3 : index
    %35 = memref.load %arg6[%c3_19] : memref<4xf32, #tpu.memory_space<smem>>
    %c0_20 = arith.constant 0 : index
    %36 = memref.load %arg7[%c0_20] : memref<8xf32, #tpu.memory_space<smem>>
    %c1_21 = arith.constant 1 : index
    %37 = memref.load %arg7[%c1_21] : memref<8xf32, #tpu.memory_space<smem>>
    %c2_22 = arith.constant 2 : index
    %38 = memref.load %arg7[%c2_22] : memref<8xf32, #tpu.memory_space<smem>>
    %c3_23 = arith.constant 3 : index
    %39 = memref.load %arg7[%c3_23] : memref<8xf32, #tpu.memory_space<smem>>
    %c4_24 = arith.constant 4 : index
    %40 = memref.load %arg7[%c4_24] : memref<8xf32, #tpu.memory_space<smem>>
    %c5_25 = arith.constant 5 : index
    %41 = memref.load %arg7[%c5_25] : memref<8xf32, #tpu.memory_space<smem>>
    %c6_26 = arith.constant 6 : index
    %42 = memref.load %arg7[%c6_26] : memref<8xf32, #tpu.memory_space<smem>>
    %c7_27 = arith.constant 7 : index
    %43 = memref.load %arg7[%c7_27] : memref<8xf32, #tpu.memory_space<smem>>
    %c0_28 = arith.constant 0 : index
    %44 = memref.load %arg8[%c0_28] : memref<2xf32, #tpu.memory_space<smem>>
    %c1_29 = arith.constant 1 : index
    %45 = memref.load %arg8[%c1_29] : memref<2xf32, #tpu.memory_space<smem>>
    %c0_30 = arith.constant 0 : index
    %c0_31 = arith.constant 0 : index
    %c0_32 = arith.constant 0 : index
    %c0_33 = arith.constant 0 : index
    %46 = vector.load %arg2[%c0_30, %c0_31, %c0_32, %c0_33] : memref<1x4x1x256xf32, #tpu.memory_space<vmem>>, vector<1x1x1x256xf32>
    %47 = vector.shape_cast %46 : vector<1x1x1x256xf32> to vector<1x256xf32>
    %48 = vector.broadcast %0 : f32 to vector<1x256xf32>
    %49 = arith.mulf %47, %48 : vector<1x256xf32>
    %50 = vector.broadcast %32 : f32 to vector<1x256xf32>
    %51 = arith.addf %49, %50 : vector<1x256xf32>
    %c0_34 = arith.constant 0 : index
    %c1_35 = arith.constant 1 : index
    %c0_36 = arith.constant 0 : index
    %c0_37 = arith.constant 0 : index
    %52 = vector.load %arg2[%c0_34, %c1_35, %c0_36, %c0_37] : memref<1x4x1x256xf32, #tpu.memory_space<vmem>>, vector<1x1x1x256xf32>
    %53 = vector.shape_cast %52 : vector<1x1x1x256xf32> to vector<1x256xf32>
    %54 = vector.broadcast %1 : f32 to vector<1x256xf32>
    %55 = arith.mulf %53, %54 : vector<1x256xf32>
    %56 = arith.addf %51, %55 : vector<1x256xf32>
    %c0_38 = arith.constant 0 : index
    %c2_39 = arith.constant 2 : index
    %c0_40 = arith.constant 0 : index
    %c0_41 = arith.constant 0 : index
    %57 = vector.load %arg2[%c0_38, %c2_39, %c0_40, %c0_41] : memref<1x4x1x256xf32, #tpu.memory_space<vmem>>, vector<1x1x1x256xf32>
    %58 = vector.shape_cast %57 : vector<1x1x1x256xf32> to vector<1x256xf32>
    %59 = vector.broadcast %2 : f32 to vector<1x256xf32>
    %60 = arith.mulf %58, %59 : vector<1x256xf32>
    %61 = arith.addf %56, %60 : vector<1x256xf32>
    %c0_42 = arith.constant 0 : index
    %c3_43 = arith.constant 3 : index
    %c0_44 = arith.constant 0 : index
    %c0_45 = arith.constant 0 : index
    %62 = vector.load %arg2[%c0_42, %c3_43, %c0_44, %c0_45] : memref<1x4x1x256xf32, #tpu.memory_space<vmem>>, vector<1x1x1x256xf32>
    %63 = vector.shape_cast %62 : vector<1x1x1x256xf32> to vector<1x256xf32>
    %64 = vector.broadcast %3 : f32 to vector<1x256xf32>
    %65 = arith.mulf %63, %64 : vector<1x256xf32>
    %66 = arith.addf %61, %65 : vector<1x256xf32>
    %c0_46 = arith.constant 0 : index
    %c0_47 = arith.constant 0 : index
    %c0_48 = arith.constant 0 : index
    %c0_49 = arith.constant 0 : index
    %67 = vector.load %arg3[%c0_46, %c0_47, %c0_48, %c0_49] : memref<1x4x1x256xf32, #tpu.memory_space<vmem>>, vector<1x1x1x256xf32>
    %68 = vector.shape_cast %67 : vector<1x1x1x256xf32> to vector<1x256xf32>
    %69 = vector.broadcast %16 : f32 to vector<1x256xf32>
    %70 = arith.mulf %68, %69 : vector<1x256xf32>
    %71 = arith.addf %66, %70 : vector<1x256xf32>
    %c0_50 = arith.constant 0 : index
    %c1_51 = arith.constant 1 : index
    %c0_52 = arith.constant 0 : index
    %c0_53 = arith.constant 0 : index
    %72 = vector.load %arg3[%c0_50, %c1_51, %c0_52, %c0_53] : memref<1x4x1x256xf32, #tpu.memory_space<vmem>>, vector<1x1x1x256xf32>
    %73 = vector.shape_cast %72 : vector<1x1x1x256xf32> to vector<1x256xf32>
    %74 = vector.broadcast %17 : f32 to vector<1x256xf32>
    %75 = arith.mulf %73, %74 : vector<1x256xf32>
    %76 = arith.addf %71, %75 : vector<1x256xf32>
    %c0_54 = arith.constant 0 : index
    %c2_55 = arith.constant 2 : index
    %c0_56 = arith.constant 0 : index
    %c0_57 = arith.constant 0 : index
    %77 = vector.load %arg3[%c0_54, %c2_55, %c0_56, %c0_57] : memref<1x4x1x256xf32, #tpu.memory_space<vmem>>, vector<1x1x1x256xf32>
    %78 = vector.shape_cast %77 : vector<1x1x1x256xf32> to vector<1x256xf32>
    %79 = vector.broadcast %18 : f32 to vector<1x256xf32>
    %80 = arith.mulf %78, %79 : vector<1x256xf32>
    %81 = arith.addf %76, %80 : vector<1x256xf32>
    %c0_58 = arith.constant 0 : index
    %c3_59 = arith.constant 3 : index
    %c0_60 = arith.constant 0 : index
    %c0_61 = arith.constant 0 : index
    %82 = vector.load %arg3[%c0_58, %c3_59, %c0_60, %c0_61] : memref<1x4x1x256xf32, #tpu.memory_space<vmem>>, vector<1x1x1x256xf32>
    %83 = vector.shape_cast %82 : vector<1x1x1x256xf32> to vector<1x256xf32>
    %84 = vector.broadcast %19 : f32 to vector<1x256xf32>
    %85 = arith.mulf %83, %84 : vector<1x256xf32>
    %86 = arith.addf %81, %85 : vector<1x256xf32>
    %cst = arith.constant 0.000000e+00 : f32
    %87 = vector.broadcast %cst : f32 to vector<1x256xf32>
    %88 = arith.maximumf %86, %87 : vector<1x256xf32>
    %c0_62 = arith.constant 0 : index
    %c0_63 = arith.constant 0 : index
    %c0_64 = arith.constant 0 : index
    %c0_65 = arith.constant 0 : index
    %89 = vector.load %arg2[%c0_62, %c0_63, %c0_64, %c0_65] : memref<1x4x1x256xf32, #tpu.memory_space<vmem>>, vector<1x1x1x256xf32>
    %90 = vector.shape_cast %89 : vector<1x1x1x256xf32> to vector<1x256xf32>
    %91 = vector.broadcast %4 : f32 to vector<1x256xf32>
    %92 = arith.mulf %90, %91 : vector<1x256xf32>
    %93 = vector.broadcast %33 : f32 to vector<1x256xf32>
    %94 = arith.addf %92, %93 : vector<1x256xf32>
    %c0_66 = arith.constant 0 : index
    %c1_67 = arith.constant 1 : index
    %c0_68 = arith.constant 0 : index
    %c0_69 = arith.constant 0 : index
    %95 = vector.load %arg2[%c0_66, %c1_67, %c0_68, %c0_69] : memref<1x4x1x256xf32, #tpu.memory_space<vmem>>, vector<1x1x1x256xf32>
    %96 = vector.shape_cast %95 : vector<1x1x1x256xf32> to vector<1x256xf32>
    %97 = vector.broadcast %5 : f32 to vector<1x256xf32>
    %98 = arith.mulf %96, %97 : vector<1x256xf32>
    %99 = arith.addf %94, %98 : vector<1x256xf32>
    %c0_70 = arith.constant 0 : index
    %c2_71 = arith.constant 2 : index
    %c0_72 = arith.constant 0 : index
    %c0_73 = arith.constant 0 : index
    %100 = vector.load %arg2[%c0_70, %c2_71, %c0_72, %c0_73] : memref<1x4x1x256xf32, #tpu.memory_space<vmem>>, vector<1x1x1x256xf32>
    %101 = vector.shape_cast %100 : vector<1x1x1x256xf32> to vector<1x256xf32>
    %102 = vector.broadcast %6 : f32 to vector<1x256xf32>
    %103 = arith.mulf %101, %102 : vector<1x256xf32>
    %104 = arith.addf %99, %103 : vector<1x256xf32>
    %c0_74 = arith.constant 0 : index
    %c3_75 = arith.constant 3 : index
    %c0_76 = arith.constant 0 : index
    %c0_77 = arith.constant 0 : index
    %105 = vector.load %arg2[%c0_74, %c3_75, %c0_76, %c0_77] : memref<1x4x1x256xf32, #tpu.memory_space<vmem>>, vector<1x1x1x256xf32>
    %106 = vector.shape_cast %105 : vector<1x1x1x256xf32> to vector<1x256xf32>
    %107 = vector.broadcast %7 : f32 to vector<1x256xf32>
    %108 = arith.mulf %106, %107 : vector<1x256xf32>
    %109 = arith.addf %104, %108 : vector<1x256xf32>
    %c0_78 = arith.constant 0 : index
    %c0_79 = arith.constant 0 : index
    %c0_80 = arith.constant 0 : index
    %c0_81 = arith.constant 0 : index
    %110 = vector.load %arg3[%c0_78, %c0_79, %c0_80, %c0_81] : memref<1x4x1x256xf32, #tpu.memory_space<vmem>>, vector<1x1x1x256xf32>
    %111 = vector.shape_cast %110 : vector<1x1x1x256xf32> to vector<1x256xf32>
    %112 = vector.broadcast %20 : f32 to vector<1x256xf32>
    %113 = arith.mulf %111, %112 : vector<1x256xf32>
    %114 = arith.addf %109, %113 : vector<1x256xf32>
    %c0_82 = arith.constant 0 : index
    %c1_83 = arith.constant 1 : index
    %c0_84 = arith.constant 0 : index
    %c0_85 = arith.constant 0 : index
    %115 = vector.load %arg3[%c0_82, %c1_83, %c0_84, %c0_85] : memref<1x4x1x256xf32, #tpu.memory_space<vmem>>, vector<1x1x1x256xf32>
    %116 = vector.shape_cast %115 : vector<1x1x1x256xf32> to vector<1x256xf32>
    %117 = vector.broadcast %21 : f32 to vector<1x256xf32>
    %118 = arith.mulf %116, %117 : vector<1x256xf32>
    %119 = arith.addf %114, %118 : vector<1x256xf32>
    %c0_86 = arith.constant 0 : index
    %c2_87 = arith.constant 2 : index
    %c0_88 = arith.constant 0 : index
    %c0_89 = arith.constant 0 : index
    %120 = vector.load %arg3[%c0_86, %c2_87, %c0_88, %c0_89] : memref<1x4x1x256xf32, #tpu.memory_space<vmem>>, vector<1x1x1x256xf32>
    %121 = vector.shape_cast %120 : vector<1x1x1x256xf32> to vector<1x256xf32>
    %122 = vector.broadcast %22 : f32 to vector<1x256xf32>
    %123 = arith.mulf %121, %122 : vector<1x256xf32>
    %124 = arith.addf %119, %123 : vector<1x256xf32>
    %c0_90 = arith.constant 0 : index
    %c3_91 = arith.constant 3 : index
    %c0_92 = arith.constant 0 : index
    %c0_93 = arith.constant 0 : index
    %125 = vector.load %arg3[%c0_90, %c3_91, %c0_92, %c0_93] : memref<1x4x1x256xf32, #tpu.memory_space<vmem>>, vector<1x1x1x256xf32>
    %126 = vector.shape_cast %125 : vector<1x1x1x256xf32> to vector<1x256xf32>
    %127 = vector.broadcast %23 : f32 to vector<1x256xf32>
    %128 = arith.mulf %126, %127 : vector<1x256xf32>
    %129 = arith.addf %124, %128 : vector<1x256xf32>
    %cst_94 = arith.constant 0.000000e+00 : f32
    %130 = vector.broadcast %cst_94 : f32 to vector<1x256xf32>
    %131 = arith.maximumf %129, %130 : vector<1x256xf32>
    %c0_95 = arith.constant 0 : index
    %c0_96 = arith.constant 0 : index
    %c0_97 = arith.constant 0 : index
    %c0_98 = arith.constant 0 : index
    %132 = vector.load %arg2[%c0_95, %c0_96, %c0_97, %c0_98] : memref<1x4x1x256xf32, #tpu.memory_space<vmem>>, vector<1x1x1x256xf32>
    %133 = vector.shape_cast %132 : vector<1x1x1x256xf32> to vector<1x256xf32>
    %134 = vector.broadcast %8 : f32 to vector<1x256xf32>
    %135 = arith.mulf %133, %134 : vector<1x256xf32>
    %136 = vector.broadcast %34 : f32 to vector<1x256xf32>
    %137 = arith.addf %135, %136 : vector<1x256xf32>
    %c0_99 = arith.constant 0 : index
    %c1_100 = arith.constant 1 : index
    %c0_101 = arith.constant 0 : index
    %c0_102 = arith.constant 0 : index
    %138 = vector.load %arg2[%c0_99, %c1_100, %c0_101, %c0_102] : memref<1x4x1x256xf32, #tpu.memory_space<vmem>>, vector<1x1x1x256xf32>
    %139 = vector.shape_cast %138 : vector<1x1x1x256xf32> to vector<1x256xf32>
    %140 = vector.broadcast %9 : f32 to vector<1x256xf32>
    %141 = arith.mulf %139, %140 : vector<1x256xf32>
    %142 = arith.addf %137, %141 : vector<1x256xf32>
    %c0_103 = arith.constant 0 : index
    %c2_104 = arith.constant 2 : index
    %c0_105 = arith.constant 0 : index
    %c0_106 = arith.constant 0 : index
    %143 = vector.load %arg2[%c0_103, %c2_104, %c0_105, %c0_106] : memref<1x4x1x256xf32, #tpu.memory_space<vmem>>, vector<1x1x1x256xf32>
    %144 = vector.shape_cast %143 : vector<1x1x1x256xf32> to vector<1x256xf32>
    %145 = vector.broadcast %10 : f32 to vector<1x256xf32>
    %146 = arith.mulf %144, %145 : vector<1x256xf32>
    %147 = arith.addf %142, %146 : vector<1x256xf32>
    %c0_107 = arith.constant 0 : index
    %c3_108 = arith.constant 3 : index
    %c0_109 = arith.constant 0 : index
    %c0_110 = arith.constant 0 : index
    %148 = vector.load %arg2[%c0_107, %c3_108, %c0_109, %c0_110] : memref<1x4x1x256xf32, #tpu.memory_space<vmem>>, vector<1x1x1x256xf32>
    %149 = vector.shape_cast %148 : vector<1x1x1x256xf32> to vector<1x256xf32>
    %150 = vector.broadcast %11 : f32 to vector<1x256xf32>
    %151 = arith.mulf %149, %150 : vector<1x256xf32>
    %152 = arith.addf %147, %151 : vector<1x256xf32>
    %c0_111 = arith.constant 0 : index
    %c0_112 = arith.constant 0 : index
    %c0_113 = arith.constant 0 : index
    %c0_114 = arith.constant 0 : index
    %153 = vector.load %arg3[%c0_111, %c0_112, %c0_113, %c0_114] : memref<1x4x1x256xf32, #tpu.memory_space<vmem>>, vector<1x1x1x256xf32>
    %154 = vector.shape_cast %153 : vector<1x1x1x256xf32> to vector<1x256xf32>
    %155 = vector.broadcast %24 : f32 to vector<1x256xf32>
    %156 = arith.mulf %154, %155 : vector<1x256xf32>
    %157 = arith.addf %152, %156 : vector<1x256xf32>
    %c0_115 = arith.constant 0 : index
    %c1_116 = arith.constant 1 : index
    %c0_117 = arith.constant 0 : index
    %c0_118 = arith.constant 0 : index
    %158 = vector.load %arg3[%c0_115, %c1_116, %c0_117, %c0_118] : memref<1x4x1x256xf32, #tpu.memory_space<vmem>>, vector<1x1x1x256xf32>
    %159 = vector.shape_cast %158 : vector<1x1x1x256xf32> to vector<1x256xf32>
    %160 = vector.broadcast %25 : f32 to vector<1x256xf32>
    %161 = arith.mulf %159, %160 : vector<1x256xf32>
    %162 = arith.addf %157, %161 : vector<1x256xf32>
    %c0_119 = arith.constant 0 : index
    %c2_120 = arith.constant 2 : index
    %c0_121 = arith.constant 0 : index
    %c0_122 = arith.constant 0 : index
    %163 = vector.load %arg3[%c0_119, %c2_120, %c0_121, %c0_122] : memref<1x4x1x256xf32, #tpu.memory_space<vmem>>, vector<1x1x1x256xf32>
    %164 = vector.shape_cast %163 : vector<1x1x1x256xf32> to vector<1x256xf32>
    %165 = vector.broadcast %26 : f32 to vector<1x256xf32>
    %166 = arith.mulf %164, %165 : vector<1x256xf32>
    %167 = arith.addf %162, %166 : vector<1x256xf32>
    %c0_123 = arith.constant 0 : index
    %c3_124 = arith.constant 3 : index
    %c0_125 = arith.constant 0 : index
    %c0_126 = arith.constant 0 : index
    %168 = vector.load %arg3[%c0_123, %c3_124, %c0_125, %c0_126] : memref<1x4x1x256xf32, #tpu.memory_space<vmem>>, vector<1x1x1x256xf32>
    %169 = vector.shape_cast %168 : vector<1x1x1x256xf32> to vector<1x256xf32>
    %170 = vector.broadcast %27 : f32 to vector<1x256xf32>
    %171 = arith.mulf %169, %170 : vector<1x256xf32>
    %172 = arith.addf %167, %171 : vector<1x256xf32>
    %cst_127 = arith.constant 0.000000e+00 : f32
    %173 = vector.broadcast %cst_127 : f32 to vector<1x256xf32>
    %174 = arith.maximumf %172, %173 : vector<1x256xf32>
    %c0_128 = arith.constant 0 : index
    %c0_129 = arith.constant 0 : index
    %c0_130 = arith.constant 0 : index
    %c0_131 = arith.constant 0 : index
    %175 = vector.load %arg2[%c0_128, %c0_129, %c0_130, %c0_131] : memref<1x4x1x256xf32, #tpu.memory_space<vmem>>, vector<1x1x1x256xf32>
    %176 = vector.shape_cast %175 : vector<1x1x1x256xf32> to vector<1x256xf32>
    %177 = vector.broadcast %12 : f32 to vector<1x256xf32>
    %178 = arith.mulf %176, %177 : vector<1x256xf32>
    %179 = vector.broadcast %35 : f32 to vector<1x256xf32>
    %180 = arith.addf %178, %179 : vector<1x256xf32>
    %c0_132 = arith.constant 0 : index
    %c1_133 = arith.constant 1 : index
    %c0_134 = arith.constant 0 : index
    %c0_135 = arith.constant 0 : index
    %181 = vector.load %arg2[%c0_132, %c1_133, %c0_134, %c0_135] : memref<1x4x1x256xf32, #tpu.memory_space<vmem>>, vector<1x1x1x256xf32>
    %182 = vector.shape_cast %181 : vector<1x1x1x256xf32> to vector<1x256xf32>
    %183 = vector.broadcast %13 : f32 to vector<1x256xf32>
    %184 = arith.mulf %182, %183 : vector<1x256xf32>
    %185 = arith.addf %180, %184 : vector<1x256xf32>
    %c0_136 = arith.constant 0 : index
    %c2_137 = arith.constant 2 : index
    %c0_138 = arith.constant 0 : index
    %c0_139 = arith.constant 0 : index
    %186 = vector.load %arg2[%c0_136, %c2_137, %c0_138, %c0_139] : memref<1x4x1x256xf32, #tpu.memory_space<vmem>>, vector<1x1x1x256xf32>
    %187 = vector.shape_cast %186 : vector<1x1x1x256xf32> to vector<1x256xf32>
    %188 = vector.broadcast %14 : f32 to vector<1x256xf32>
    %189 = arith.mulf %187, %188 : vector<1x256xf32>
    %190 = arith.addf %185, %189 : vector<1x256xf32>
    %c0_140 = arith.constant 0 : index
    %c3_141 = arith.constant 3 : index
    %c0_142 = arith.constant 0 : index
    %c0_143 = arith.constant 0 : index
    %191 = vector.load %arg2[%c0_140, %c3_141, %c0_142, %c0_143] : memref<1x4x1x256xf32, #tpu.memory_space<vmem>>, vector<1x1x1x256xf32>
    %192 = vector.shape_cast %191 : vector<1x1x1x256xf32> to vector<1x256xf32>
    %193 = vector.broadcast %15 : f32 to vector<1x256xf32>
    %194 = arith.mulf %192, %193 : vector<1x256xf32>
    %195 = arith.addf %190, %194 : vector<1x256xf32>
    %c0_144 = arith.constant 0 : index
    %c0_145 = arith.constant 0 : index
    %c0_146 = arith.constant 0 : index
    %c0_147 = arith.constant 0 : index
    %196 = vector.load %arg3[%c0_144, %c0_145, %c0_146, %c0_147] : memref<1x4x1x256xf32, #tpu.memory_space<vmem>>, vector<1x1x1x256xf32>
    %197 = vector.shape_cast %196 : vector<1x1x1x256xf32> to vector<1x256xf32>
    %198 = vector.broadcast %28 : f32 to vector<1x256xf32>
    %199 = arith.mulf %197, %198 : vector<1x256xf32>
    %200 = arith.addf %195, %199 : vector<1x256xf32>
    %c0_148 = arith.constant 0 : index
    %c1_149 = arith.constant 1 : index
    %c0_150 = arith.constant 0 : index
    %c0_151 = arith.constant 0 : index
    %201 = vector.load %arg3[%c0_148, %c1_149, %c0_150, %c0_151] : memref<1x4x1x256xf32, #tpu.memory_space<vmem>>, vector<1x1x1x256xf32>
    %202 = vector.shape_cast %201 : vector<1x1x1x256xf32> to vector<1x256xf32>
    %203 = vector.broadcast %29 : f32 to vector<1x256xf32>
    %204 = arith.mulf %202, %203 : vector<1x256xf32>
    %205 = arith.addf %200, %204 : vector<1x256xf32>
    %c0_152 = arith.constant 0 : index
    %c2_153 = arith.constant 2 : index
    %c0_154 = arith.constant 0 : index
    %c0_155 = arith.constant 0 : index
    %206 = vector.load %arg3[%c0_152, %c2_153, %c0_154, %c0_155] : memref<1x4x1x256xf32, #tpu.memory_space<vmem>>, vector<1x1x1x256xf32>
    %207 = vector.shape_cast %206 : vector<1x1x1x256xf32> to vector<1x256xf32>
    %208 = vector.broadcast %30 : f32 to vector<1x256xf32>
    %209 = arith.mulf %207, %208 : vector<1x256xf32>
    %210 = arith.addf %205, %209 : vector<1x256xf32>
    %c0_156 = arith.constant 0 : index
    %c3_157 = arith.constant 3 : index
    %c0_158 = arith.constant 0 : index
    %c0_159 = arith.constant 0 : index
    %211 = vector.load %arg3[%c0_156, %c3_157, %c0_158, %c0_159] : memref<1x4x1x256xf32, #tpu.memory_space<vmem>>, vector<1x1x1x256xf32>
    %212 = vector.shape_cast %211 : vector<1x1x1x256xf32> to vector<1x256xf32>
    %213 = vector.broadcast %31 : f32 to vector<1x256xf32>
    %214 = arith.mulf %212, %213 : vector<1x256xf32>
    %215 = arith.addf %210, %214 : vector<1x256xf32>
    %cst_160 = arith.constant 0.000000e+00 : f32
    %216 = vector.broadcast %cst_160 : f32 to vector<1x256xf32>
    %217 = arith.maximumf %215, %216 : vector<1x256xf32>
    %218 = vector.broadcast %36 : f32 to vector<1x256xf32>
    %219 = arith.mulf %88, %218 : vector<1x256xf32>
    %220 = vector.broadcast %44 : f32 to vector<1x256xf32>
    %221 = arith.addf %219, %220 : vector<1x256xf32>
    %222 = vector.broadcast %37 : f32 to vector<1x256xf32>
    %223 = arith.mulf %131, %222 : vector<1x256xf32>
    %224 = arith.addf %221, %223 : vector<1x256xf32>
    %225 = vector.broadcast %38 : f32 to vector<1x256xf32>
    %226 = arith.mulf %174, %225 : vector<1x256xf32>
    %227 = arith.addf %224, %226 : vector<1x256xf32>
    %228 = vector.broadcast %39 : f32 to vector<1x256xf32>
    %229 = arith.mulf %217, %228 : vector<1x256xf32>
    %230 = arith.addf %227, %229 : vector<1x256xf32>
    %cst_161 = arith.constant 5.000000e-01 : f32
    %231 = vector.broadcast %cst_161 : f32 to vector<1x256xf32>
    %232 = arith.mulf %231, %230 : vector<1x256xf32>
    %233 = math.tanh %232 : vector<1x256xf32>
    %cst_162 = arith.constant 5.000000e-01 : f32
    %234 = vector.broadcast %cst_162 : f32 to vector<1x256xf32>
    %235 = arith.mulf %234, %233 : vector<1x256xf32>
    %cst_163 = arith.constant 5.000000e-01 : f32
    %236 = vector.broadcast %cst_163 : f32 to vector<1x256xf32>
    %237 = arith.addf %235, %236 : vector<1x256xf32>
    %c0_164 = arith.constant 0 : index
    %c0_165 = arith.constant 0 : index
    %c0_166 = arith.constant 0 : index
    %c0_167 = arith.constant 0 : index
    %238 = vector.load %arg9[%c0_164, %c0_165, %c0_166, %c0_167] : memref<2x1x1x256xf32, #tpu.memory_space<vmem>>, vector<1x1x1x256xf32>
    %239 = vector.shape_cast %238 : vector<1x1x1x256xf32> to vector<1x256xf32>
    %240 = vector.shape_cast %237 : vector<1x256xf32> to vector<1x1x1x256xf32>
    tpu.vector_store %arg9[%c0_164, %c0_165, %c0_166, %c0_167], %240 {strides = array<i32>} : memref<2x1x1x256xf32, #tpu.memory_space<vmem>>, vector<1x1x1x256xf32>,
    %241 = vector.broadcast %40 : f32 to vector<1x256xf32>
    %242 = arith.mulf %88, %241 : vector<1x256xf32>
    %243 = vector.broadcast %45 : f32 to vector<1x256xf32>
    %244 = arith.addf %242, %243 : vector<1x256xf32>
    %245 = vector.broadcast %41 : f32 to vector<1x256xf32>
    %246 = arith.mulf %131, %245 : vector<1x256xf32>
    %247 = arith.addf %244, %246 : vector<1x256xf32>
    %248 = vector.broadcast %42 : f32 to vector<1x256xf32>
    %249 = arith.mulf %174, %248 : vector<1x256xf32>
    %250 = arith.addf %247, %249 : vector<1x256xf32>
    %251 = vector.broadcast %43 : f32 to vector<1x256xf32>
    %252 = arith.mulf %217, %251 : vector<1x256xf32>
    %253 = arith.addf %250, %252 : vector<1x256xf32>
    %cst_168 = arith.constant 5.000000e-01 : f32
    %254 = vector.broadcast %cst_168 : f32 to vector<1x256xf32>
    %255 = arith.mulf %254, %253 : vector<1x256xf32>
    %256 = math.tanh %255 : vector<1x256xf32>
    %cst_169 = arith.constant 5.000000e-01 : f32
    %257 = vector.broadcast %cst_169 : f32 to vector<1x256xf32>
    %258 = arith.mulf %257, %256 : vector<1x256xf32>
    %cst_170 = arith.constant 5.000000e-01 : f32
    %259 = vector.broadcast %cst_170 : f32 to vector<1x256xf32>
    %260 = arith.addf %258, %259 : vector<1x256xf32>
    %c1_171 = arith.constant 1 : index
    %c0_172 = arith.constant 0 : index
    %c0_173 = arith.constant 0 : index
    %c0_174 = arith.constant 0 : index
    %261 = vector.load %arg9[%c1_171, %c0_172, %c0_173, %c0_174] : memref<2x1x1x256xf32, #tpu.memory_space<vmem>>, vector<1x1x1x256xf32>
    %262 = vector.shape_cast %261 : vector<1x1x1x256xf32> to vector<1x256xf32>
    %263 = vector.shape_cast %260 : vector<1x256xf32> to vector<1x1x1x256xf32>
    tpu.vector_store %arg9[%c1_171, %c0_172, %c0_173, %c0_174], %263 {strides = array<i32>} : memref<2x1x1x256xf32, #tpu.memory_space<vmem>>, vector<1x1x1x256xf32>,
    return
  }
  func.func @transform_0(%arg0: i32, %arg1: i32) -> (i32, i32, i32, i32) {
    %c0_i32 = arith.constant 0 : i32
    %c0_i32_0 = arith.constant 0 : i32
    %c0_i32_1 = arith.constant 0 : i32
    return %arg0, %c0_i32, %arg1, %c0_i32_0 : i32, i32, i32, i32
  }
  func.func @transform_1(%arg0: i32, %arg1: i32) -> (i32, i32, i32, i32) {
    %c0_i32 = arith.constant 0 : i32
    %c0_i32_0 = arith.constant 0 : i32
    %c0_i32_1 = arith.constant 0 : i32
    return %arg0, %c0_i32, %arg1, %c0_i32_0 : i32, i32, i32, i32
  }
  func.func @transform_2(%arg0: i32, %arg1: i32) -> i32 {
    %c0_i32 = arith.constant 0 : i32
    %c0_i32_0 = arith.constant 0 : i32
    return %c0_i32 : i32
  }
  func.func @transform_3(%arg0: i32, %arg1: i32) -> i32 {
    %c0_i32 = arith.constant 0 : i32
    %c0_i32_0 = arith.constant 0 : i32
    return %c0_i32 : i32
  }
  func.func @transform_4(%arg0: i32, %arg1: i32) -> i32 {
    %c0_i32 = arith.constant 0 : i32
    %c0_i32_0 = arith.constant 0 : i32
    return %c0_i32 : i32
  }
  func.func @transform_5(%arg0: i32, %arg1: i32) -> i32 {
    %c0_i32 = arith.constant 0 : i32
    %c0_i32_0 = arith.constant 0 : i32
    return %c0_i32 : i32
  }
  func.func @transform_6(%arg0: i32, %arg1: i32) -> i32 {
    %c0_i32 = arith.constant 0 : i32
    %c0_i32_0 = arith.constant 0 : i32
    return %c0_i32 : i32
  }
  func.func @transform_7(%arg0: i32, %arg1: i32) -> (i32, i32, i32, i32) {
    %c0_i32 = arith.constant 0 : i32
    %c0_i32_0 = arith.constant 0 : i32
    %c0_i32_1 = arith.constant 0 : i32
    return %c0_i32, %arg0, %arg1, %c0_i32_0 : i32, i32, i32, i32
  }
}

</mosaic_0001>

<bundles_post_ra>
// kernel: spatial_weights.1
= control target key start
LH: loop header
LB: loop body
LE: loop exit
PB: predicated region body
PF: predicated region fallthrough
CT: control target
= control target key end

     0   :  { %s1434_s0 = inlined_call_operand.vmem [shape: f32[2,4,1,256], index: 0, kind: input, shape index: {}]   ;;  %s1435_s1 = inlined_call_operand.vmem [shape: f32[2,4,1,256], index: 1, kind: input, shape index: {}]   ;;  %s1436_s2 = inlined_call_operand.vmem [shape: f32[16], index: 2, kind: input, shape index: {}]   ;;  %s1437_s3 = inlined_call_operand.vmem [shape: f32[16], index: 3, kind: input, shape index: {}]   ;;  %s1438_s4 = inlined_call_operand.vmem [shape: f32[4], index: 4, kind: input, shape index: {}]   ;;  %s1439_s5 = inlined_call_operand.vmem [shape: f32[8], index: 5, kind: input, shape index: {}]   ;;  %s1440_s6 = inlined_call_operand.vmem [shape: f32[2], index: 6, kind: input, shape index: {}]   ;;  %s1441_s7 = inlined_call_operand.vmem [shape: f32[2,2,1,256], index: 7, kind: output, shape index: {}]  }
   0x1   :  { %1452 = sst [smem:[#allocation22_spill]] %s1436_s2 }
   0x2   :  { %1453 = sst [smem:[#allocation23_spill]] %s1437_s3 }
   0x3   :  { %1454 = sst [smem:[#allocation24_spill]] %s1438_s4 }
   0x4   :  { %1455 = sst [smem:[#allocation25_spill]] %s1439_s5 }
   0x5   :  { %1456 = sst [smem:[#allocation26_spill]] %s1440_s6 }
   0x6   :  { %1457 = sst [smem:[#allocation27_spill]] %s1441_s7 }
   0x7   :  { %12 = vsyncpa [#allocation3], 0 }
   0x8   :  { %13 = vsyncpa [#allocation5], 0 }
   0x9   :  { %14 = vsyncpa [#allocation8], 0  ;;  %s1118_s24 = smov 0   ;;  %s1120_s25 = smov 0  }
   0xa   :  { %s1122_s26 = smov 0   ;;  %s1124_s27 = smov 0  }
   0xb   :  { %s1126_s28 = smov 0  }
   0xc LB: > { %1458 = sst [smem:[#allocation14_spill]] %s1055_s24  ;;  %s781_s29 = sadd.s32 4294967295, %s1071_s28   ;;  %s1071_s28 = sphi %s1126_s28, %s20_s28   ;;  %s1067_s27 = sphi %s1124_s27, %s1487_s27   ;;  %s1063_s26 = sphi %s1122_s26, %s1486_s26   ;;  %s1059_s25 = sphi %s1120_s25, %s1485_s25   ;;  %s1055_s24 = sphi %s1118_s24, %s1484_s24  }
   0xd   : > { %1459 = sst [smem:[#allocation15_spill]] %s1059_s25  ;;  %s32_s30 = sadd.s32 1, %s1067_s27 }
   0xe   : > { %1460 = sst [smem:[#allocation16_spill]] %s1063_s26  ;;  %p34_p0 = scmp.ge.s32.totalorder %s32_s30, 2 }
   0xf   : > { %1461 = sst [smem:[#allocation17_spill]] %s1067_s27  ;;  %s202_s8 = sadd.s32 1, %s1059_s25 }
  0x10   : > { %1462 = sst [smem:[#allocation18_spill]] %s1071_s28  ;;  %p212_p1 = scmp.ne.s32.totalorder %s1059_s25, %s1055_s24 }
  0x11   : > { %p213_p2 = scmp.eq.s32.totalorder %s781_s29, 1  ;;  %s1489_s30 = smov (%p34_p0, %s32_s30), 0 }
  0x12   : > { %1463 = sst [smem:[#allocation19_spill]] %s1489_s30  ;;  %p783_p4 = scmp.ge.s32.totalorder %s1071_s28, 1 }
  0x13   : > { %p1150_p3 = por %p213_p2, %p212_p1  ;;  %s197_s10 = ssub.s32 %s1067_s27, %s1489_s30 }
  0x14   : > { %p226_p5 = scmp.lt.s32.totalorder %s1071_s28, 3  ;;  %p200_p6 = scmp.eq.s32.totalorder %s197_s10, 0 }
  0x15   : > { %s1464_s9 = scalar_select %p1150_p3, 1, 0 }
  0x16   : > { %p1158_p7 = pnand %p783_p4, %p226_p5  ;;  %p1162_p8 = scmp.eq.s32.totalorder %s781_s29, 0 }
  0x17   : > { %1465 = sst [smem:[#allocation20_spill]] %s1464_s9 }
  0x18   : > { %s1466_s11 = scalar_select %p1158_p7, 1, 0 }
  0x19   : > { %s1467_s12 = scalar_select %p1162_p8, 1, 0 }
  0x1a   : > { %s1167_s13 = scalar_select %p200_p6, %s1059_s25, %s202_s8  }
  0x1b   : > { %p871_p9 = pneg %p1158_p7  ;;  %s1469_s3 = sld [smem:[#allocation23_spill]] }
  0x1c   : > { %1468 = sst [smem:[#allocation21_spill]] %s1167_s13 }
  0x1d   : > { %p1176_p10 = pnand %p1162_p8, %p871_p9  ;;  %s1471_s5 = sld [smem:[#allocation25_spill]] }
  0x1f   : > { %p1185_p12 = pneg %p1176_p10 }
  0x21   : > { %s250_s16 = sshll.u32 %s1469_s3, 4  ;;  %s251_s16 = int_to_ptr.vmem [resolvable:$true] %s250_s16 }
  0x22   : > { %s946_s21 = scalar_lea.vmem %s251_s16, 16  ;;  %p954_p1 = scmp.lt.s32.totalorder %s251_s16, %s251_s16 }
  0x23   : > { %s272_s20 = sshll.u32 %s1471_s5, 4  ;;  %p947_p11 = scmp.ne.s32.totalorder %s251_s16, %s946_s21  ;;  %s273_s20 = int_to_ptr.vmem [resolvable:$true] %s272_s20 }
  0x24   : > { %p955_p2 = scmp.lt.s32.totalorder %s946_s21, %s946_s21 }
  0x25   : > { %p949_p13 = pnand %p1185_p12, %p947_p11 }
  0x26   : > { %p956_p4 = por %p955_p2, %p954_p1 }
  0x27   : > { %p950_p0 = pneg %p949_p13 }
  0x29   : > { %p957_p5 = pnand %p956_p4, %p950_p0 }
  0x2b   : > { %960 = shalt.err (!%p957_p5)
}
  0x2c   : > { %s1073_s23 = smov [#allocation4]   ;;  %s961_s29 = scalar_lea.vmem %s273_s20, 16 }
  0x2d   : > { %877 = dma.vmem_to_smem (!%p1176_p10), %s251_s16, 16, %s1073_s23, [#allocation5]  }
  0x2e   : > { %p962_p6 = scmp.ne.s32.totalorder %s273_s20, %s961_s29  ;;  %p969_p8 = scmp.lt.s32.totalorder %s273_s20, %s273_s20 }
  0x2f   : > { %p970_p7 = scmp.lt.s32.totalorder %s961_s29, %s961_s29 }
  0x30   : > { %p964_p9 = pnand %p962_p6, %p1185_p12 }
  0x31   : > { %p971_p11 = por %p970_p7, %p969_p8 }
  0x32   : > { %p965_p3 = pneg %p964_p9 }
  0x34   : > { %p972_p13 = pnand %p971_p11, %p965_p3 }
  0x36   : > { %975 = shalt.err (!%p972_p13)
}
  0x37   : > { %s1074_s8 = smov [#allocation7]   ;;  %s1473_s2 = sld [smem:[#allocation22_spill]] }
  0x38   : > { %883 = dma.vmem_to_smem (!%p1176_p10), %s273_s20, 16, %s1074_s8, [#allocation8]  }
  0x3d   : > { %s239_s15 = sshll.u32 %s1473_s2, 4  ;;  %s240_s15 = int_to_ptr.vmem [resolvable:$true] %s239_s15 }
  0x3e   : > { %s976_s16 = scalar_lea.vmem %s240_s15, 16  ;;  %p984_p4 = scmp.lt.s32.totalorder %s240_s15, %s240_s15 }
  0x3f   : > { %p977_p0 = scmp.ne.s32.totalorder %s240_s15, %s976_s16  ;;  %p985_p5 = scmp.lt.s32.totalorder %s976_s16, %s976_s16 }
  0x41   : > { %p979_p1 = pnand %p977_p0, %p1185_p12  ;;  %p986_p7 = por %p985_p5, %p984_p4 }
  0x43   : > { %p980_p2 = pneg %p979_p1 }
  0x45   : > { %p987_p3 = pnand %p986_p7, %p980_p2 }
  0x47   : > { %990 = shalt.err (!%p987_p3)
}
  0x48   : > { %s1075_s18 = smov [#allocation2]   ;;  %s1474_s4 = sld [smem:[#allocation24_spill]] }
  0x49   : > { %874 = dma.vmem_to_smem (!%p1176_p10), %s240_s15, 16, %s1075_s18, [#allocation3]  }
  0x4a   : > { %s1475_s6 = sld [smem:[#allocation26_spill]] }
  0x4e   : > { %s261_s21 = sshll.u32 %s1474_s4, 4  ;;  %s262_s21 = int_to_ptr.vmem [resolvable:$true] %s261_s21 }
  0x4f   : > { %s991_s10 = scalar_lea.vmem %s262_s21, 16  ;;  %p999_p11 = scmp.lt.s32.totalorder %s262_s21, %s262_s21 }
  0x50   : > { %s283_s8 = sshll.u32 %s1475_s6, 4  ;;  %p992_p8 = scmp.ne.s32.totalorder %s262_s21, %s991_s10  ;;  %s284_s8 = int_to_ptr.vmem [resolvable:$true] %s283_s8 }
  0x51   : > { %p1000_p13 = scmp.lt.s32.totalorder %s991_s10, %s991_s10 }
  0x52   : > { %p994_p6 = pnand %p992_p8, %p1185_p12 }
  0x53   : > { %p1001_p0 = por %p1000_p13, %p999_p11 }
  0x54   : > { %p995_p9 = pneg %p994_p6 }
  0x56   : > { %p1002_p1 = pnand %p1001_p0, %p995_p9 }
  0x58   : > { %1005 = shalt.err (!%p1002_p1)
}
  0x59   : > { %s1076_s14 = smov [#allocation6]   ;;  %s1006_s15 = scalar_lea.vmem %s284_s8, 16 }
  0x5a   : > { %880 = dma.vmem_to_smem (!%p1176_p10), %s262_s21, 16, %s1076_s14, [#allocation5]  }
  0x5b   : > { %p1007_p2 = scmp.ne.s32.totalorder %s284_s8, %s1006_s15  ;;  %p1014_p7 = scmp.lt.s32.totalorder %s284_s8, %s284_s8 }
  0x5c   : > { %p1015_p3 = scmp.lt.s32.totalorder %s1006_s15, %s1006_s15 }
  0x5d   : > { %p1009_p4 = pnand %p1007_p2, %p1185_p12 }
  0x5e   : > { %p1016_p8 = por %p1015_p3, %p1014_p7 }
  0x5f   : > { %p1010_p5 = pneg %p1009_p4 }
  0x61   : > { %p1017_p6 = pnand %p1016_p8, %p1010_p5 }
  0x63   : > { %1020 = shalt.err (!%p1017_p6)
}
  0x64   : > { %s1077_s16 = smov [#allocation9]   ;;  %p1476_p9 = scmp.ne.s32.totalorder %s1466_s11, 0 }
  0x65   : > { %886 = dma.vmem_to_smem (!%p1176_p10), %s284_s8, 16, %s1077_s16, [#allocation8]  }
  0x66   : > { %318 = sbr.rel (%p1476_p9) target bundleno = 207 (0xcf), region = 48  ;;  %p1477_p11 = scmp.ne.s32.totalorder (!%p1476_p9), %s1467_s12, 0 }
  0x6b   : > { %1042 = dma.done.wait (%p1477_p11), [#allocation3], 16  }
  0x6c   : > { %1044 = vsyncadd (%p1477_p11), [#allocation3], 4294967280 }
  0x6d   : > { %1046 = dma.done.wait (%p1477_p11), [#allocation5], 32  }
  0x6e   : > { %1048 = vsyncadd (%p1477_p11), [#allocation5], 4294967264 }
  0x6f   : > { %1050 = dma.done.wait (%p1477_p11), [#allocation8], 32  }
  0x70   : > { %1052 = vsyncadd (%p1477_p11), [#allocation8], 4294967264 }
  0x71   : > { %340 = sfence }
  0x72   : > { %p377_p10 = scmp.lt.s32.totalorder %s1063_s26, 1  ;;  %s1233_s11 = sld [smem:[#allocation2]] }
  0x73   : > { %s1235_s17 = sld [smem:[#allocation2 + $0x1]] }
  0x74   : > { %s1238_s22 = scalar_select %p377_p10, %s1063_s26, 1 }
  0x75   : > { %s1240_s18 = sld [smem:[#allocation2 + $0x2]] }
  0x76   : > { %s1242_s19 = sld [smem:[#allocation2 + $0x3]]  ;;  %s797_s4 = sshll.u32 %s1238_s22, 3 }
  0x77   : > { %s1244_s20 = sld [smem:[#allocation2 + $0x4]]  ;;  %s384_s25 = scalar_lea.vmem %s1434_s0, %s797_s4 }
  0x78   : > { %s1246_s12 = sld [smem:[#allocation2 + $0x5]]  ;;  %v439_v0 = vld [vmem:[%s384_s25] sm:$0x3]  ;;  %v440_v1 = vstv %s1233_s11  ;;  %v840_v2 = vld [vmem:[%s384_s25 + $0x2] sm:$0x3] }
  0x79   : > { %s1248_s21 = sld [smem:[#allocation2 + $0x6]]  ;;  %v446_v3 = vstv %s1235_s17  ;;  %v841_v4 = vld [vmem:[%s384_s25 + $0x4] sm:$0x3]  ;;  %v842_v6 = vld [vmem:[%s384_s25 + $0x6] sm:$0x3]  ;;  %v441_v10 = vmul.f32 %v440_v1, %v439_v0 }
  0x7a   : > { %s1250_s23 = sld [smem:[#allocation2 + $0x7]]  ;;  %v447_v12 = vmul.f32 %v840_v2, %v446_v3 }
  0x7b   : > { %s1252_s29 = sld [smem:[#allocation2 + $0x8]]  ;;  %v451_v5 = vstv %s1240_s18  ;;  %s392_s18 = scalar_lea.vmem %s1435_s1, %s797_s4 }
  0x7c   : > { %s1254_s8 = sld [smem:[#allocation2 + $0x9]]  ;;  %v456_v7 = vstv %s1242_s19  ;;  %v1303_v13 = vmul.f32 %v841_v4, %v451_v5  ;;  %v459_v28 = vld [vmem:[%s392_s18] sm:$0x3]  ;;  %v1332_v30 = vld [vmem:[%s392_s18 + $0x2] sm:$0x3] }
  0x7d   : > { %s1256_s10 = sld [smem:[#allocation2 + $0xa]]  ;;  %v479_v8 = vstv %s1244_s20  ;;  %v1305_v14 = vmul.f32 %v842_v6, %v456_v7  ;;  %v1337_v34 = vld [vmem:[%s392_s18 + $0x4] sm:$0x3]  ;;  %v1342_v39 = vld [vmem:[%s392_s18 + $0x6] sm:$0x3] }
  0x7e   : > { %s1258_s14 = sld [smem:[#allocation2 + $0xb]]  ;;  %v483_v9 = vstv %s1246_s12  ;;  %v480_v16 = vmul.f32 %v479_v8, %v439_v0 }
  0x7f   : > { %s1260_s15 = sld [smem:[#allocation2 + $0xc]]  ;;  %v486_v11 = vstv %s1248_s21  ;;  %v484_v17 = vmul.f32 %v840_v2, %v483_v9 }
  0x80   : > { %s1262_s16 = sld [smem:[#allocation2 + $0xd]]  ;;  %v489_v15 = vstv %s1250_s23  ;;  %v487_v20 = vmul.f32 %v841_v4, %v486_v11 }
  0x81   : > { %s1264_s2 = sld [smem:[#allocation2 + $0xe]]  ;;  %v505_v18 = vstv %s1252_s29  ;;  %v1324_v24 = vmul.f32 %v842_v6, %v489_v15 }
  0x82   : > { %s1266_s3 = sld [smem:[#allocation2 + $0xf]]  ;;  %v509_v19 = vstv %s1254_s8  ;;  %v506_v32 = vmul.f32 %v505_v18, %v439_v0 }
  0x83   : > { %s1269_s5 = sld [smem:[#allocation4]]  ;;  %v512_v21 = vstv %s1256_s10  ;;  %v510_v33 = vmul.f32 %v840_v2, %v509_v19 }
  0x84   : > { %s1271_s6 = sld [smem:[#allocation4 + $0x1]]  ;;  %v515_v22 = vstv %s1258_s14  ;;  %v513_v36 = vmul.f32 %v841_v4, %v512_v21 }
  0x85   : > { %s1273_s30 = sld [smem:[#allocation4 + $0x2]]  ;;  %v531_v23 = vstv %s1260_s15  ;;  %v516_v37 = vmul.f32 %v842_v6, %v515_v22 }
  0x86   : > { %s1280_s28 = sld [smem:[#allocation4 + $0x3]]  ;;  %v535_v25 = vstv %s1262_s16  ;;  %v532_v38 = vmul.f32 %v531_v23, %v439_v0 }
  0x87   : > { %s1282_s7 = sld [smem:[#allocation4 + $0x4]]  ;;  %v538_v26 = vstv %s1264_s2  ;;  %v536_v41 = vmul.f32 %v840_v2, %v535_v25 }
  0x88   : > { %s1284_s26 = sld [smem:[#allocation4 + $0x5]]  ;;  %v541_v27 = vstv %s1266_s3  ;;  %v539_v42 = vmul.f32 %v841_v4, %v538_v26 }
  0x89   : > { %s1286_s9 = sld [smem:[#allocation4 + $0x6]]  ;;  %v460_v29 = vstv %s1269_s5  ;;  %v542_v43 = vmul.f32 %v842_v6, %v541_v27 }
  0x8a   : > { %s1290_s24 = sld [smem:[#allocation4 + $0x7]]  ;;  %v465_v31 = vstv %s1271_s6  ;;  %v461_v45 = vmul.f32 %v460_v29, %v459_v28 }
  0x8b   : > { %s1294_s27 = sld [smem:[#allocation4 + $0x8]]  ;;  %v470_v35 = vstv %s1273_s30  ;;  %v466_v46 = vmul.f32 %v1332_v30, %v465_v31 }
  0x8c   : > { %s1298_s13 = sld [smem:[#allocation4 + $0x9]]  ;;  %v475_v40 = vstv %s1280_s28  ;;  %v471_v49 = vmul.f32 %v1337_v34, %v470_v35 }
  0x8d   : > { %s1301_s11 = sld [smem:[#allocation4 + $0xc]]  ;;  %v492_v47 = vstv %s1282_s7  ;;  %v476_v52 = vmul.f32 %v1342_v39, %v475_v40 }
  0x8e   : > { %s1313_s19 = sld [smem:[#allocation6]]  ;;  %v495_v51 = vstv %s1284_s26  ;;  %v493_v57 = vmul.f32 %v492_v47, %v459_v28 }
  0x8f   : > { %s1317_s20 = sld [smem:[#allocation6 + $0x1]]  ;;  %v498_v54 = vstv %s1286_s9  ;;  %v496_v61 = vmul.f32 %v1332_v30, %v495_v51 }
  0x90   : > { %s1322_s22 = sld [smem:[#allocation6 + $0x2]]  ;;  %v499_v1 = vmul.f32 %v1337_v34, %v498_v54  ;;  %v501_v5 = vstv %s1290_s24 }
  0x91   : > { %s1329_s4 = sld [smem:[#allocation6 + $0x3]]  ;;  %v518_v62 = vstv %s1294_s27  ;;  %v502_v29 = vmul.f32 %v1342_v39, %v501_v5 }
  0x92   : > { %s1335_s12 = sld [smem:[#allocation4 + $0xa]]  ;;  %v521_v6 = vstv %s1298_s13 }
  0x93   : > { %s1340_s2 = sld [smem:[#allocation4 + $0xd]]  ;;  %v544_v3 = vstv %s1301_s11  ;;  %v522_v19 = vmul.f32 %v1332_v30, %v521_v6 }
  0x94   : > { %s1345_s3 = sld [smem:[#allocation4 + $0xb]]  ;;  %v442_v44 = vstv %s1313_s19 }
  0x95   : > { %s1350_s5 = sld [smem:[#allocation4 + $0xe]]  ;;  %v443_v48 = vadd.f32 %v442_v44, %v441_v10  ;;  %v481_v50 = vstv %s1317_s20  ;;  %v519_v10 = vmul.f32 %v518_v62, %v459_v28 }
  0x96   : > { %s1355_s6 = sld [smem:[#allocation4 + $0xf]]  ;;  %v482_v53 = vadd.f32 %v481_v50, %v480_v16  ;;  %v507_v55 = vstv %s1322_s22  ;;  %v545_v16 = vmul.f32 %v544_v3, %v459_v28 }
  0x97   : > { %s1360_s28 = sld [smem:[#allocation7]]  ;;  %v448_v56 = vadd.f32 %v447_v12, %v443_v48  ;;  %v508_v58 = vadd.f32 %v507_v55, %v506_v32  ;;  %v533_v59 = vstv %s1329_s4 }
  0x98   : > { %s1363_s7 = sld [smem:[#allocation7 + $0x1]]  ;;  %v485_v60 = vadd.f32 %v484_v17, %v482_v53  ;;  %v534_v63 = vadd.f32 %v533_v59, %v532_v38 }
  0x99   : > { %s1367_s26 = sld [smem:[#allocation7 + $0x2]]  ;;  %v453_v0 = vadd.f32 %v1303_v13, %v448_v56  ;;  %v511_v2 = vadd.f32 %v510_v33, %v508_v58  ;;  %v547_v11 = vstv %s1340_s2  ;;  %v524_v13 = vstv %s1335_s12 }
  0x9a   : > { %s1372_s30 = sld [smem:[#allocation7 + $0x4]]  ;;  %v488_v4 = vadd.f32 %v487_v20, %v485_v60  ;;  %v537_v7 = vadd.f32 %v536_v41, %v534_v63  ;;  %v527_v21 = vstv %s1345_s3  ;;  %v548_v23 = vmul.f32 %v1332_v30, %v547_v11 }
  0x9b   : > { %s1376_s9 = sld [smem:[#allocation7 + $0x5]]  ;;  %v458_v8 = vadd.f32 %v1305_v14, %v453_v0  ;;  %v514_v9 = vadd.f32 %v513_v36, %v511_v2  ;;  %v550_v20 = vstv %s1350_s5  ;;  %v525_v26 = vmul.f32 %v1337_v34, %v524_v13 }
  0x9c   : > { %s1380_s21 = sld [smem:[#allocation7 + $0x6]]  ;;  %v491_v12 = vadd.f32 %v1324_v24, %v488_v4  ;;  %v540_v15 = vadd.f32 %v539_v42, %v537_v7  ;;  %v553_v27 = vstv %s1355_s6  ;;  %v551_v32 = vmul.f32 %v1337_v34, %v550_v20 }
  0x9d   : > { %s1384_s24 = sld [smem:[#allocation9]]  ;;  %v462_v17 = vadd.f32 %v461_v45, %v458_v8  ;;  %v517_v18 = vadd.f32 %v516_v37, %v514_v9  ;;  %v528_v35 = vmul.f32 %v1342_v39, %v527_v21  ;;  %v554_v38 = vmul.f32 %v1342_v39, %v553_v27 }
  0x9e   : > { %s1388_s23 = sld [smem:[#allocation9 + $0x1]]  ;;  %v494_v14 = vadd.f32 %v493_v57, %v491_v12  ;;  %v543_v22 = vadd.f32 %v542_v43, %v540_v15  ;;  %v557_v42 = vstv %s1360_s28  ;;  %v561_v43 = vstv %s1363_s7 }
  0x9f   : > { %s1392_s29 = sld [smem:[#allocation7 + $0x3]]  ;;  %v467_v24 = vadd.f32 %v466_v46, %v462_v17  ;;  %v520_v25 = vadd.f32 %v519_v10, %v517_v18  ;;  %v564_v34 = vstv %s1367_s26  ;;  %v574_v12 = vlaneseq }
  0xa0   : > { %s1396_s8 = sld [smem:[#allocation7 + $0x7]]  ;;  %v497_v28 = vadd.f32 %v496_v61, %v494_v14  ;;  %v546_v31 = vadd.f32 %v545_v16, %v543_v22  ;;  %v579_v46 = vstv %s1372_s30 }
  0xa1   : > { %v472_v30 = vadd.f32 %v471_v49, %v467_v24  ;;  %v523_v33 = vadd.f32 %v522_v19, %v520_v25  ;;  %v583_v49 = vstv %s1376_s9  ;;  %s1478_s10 = sld [smem:[#allocation14_spill]]  ;;  %vm576_vm0 = vcmp.lt.s32.totalorder %v574_v12, 256 }
  0xa2   : > { %v500_v36 = vadd.f32 %v499_v1, %v497_v28  ;;  %v549_v37 = vadd.f32 %v548_v23, %v546_v31  ;;  %v586_v50 = vstv %s1380_s21  ;;  %s1479_s27 = sld [smem:[#allocation20_spill]] }
  0xa3   : > { %v477_v40 = vadd.f32 %v476_v52, %v472_v30  ;;  %v526_v41 = vadd.f32 %v525_v26, %v523_v33  ;;  %v559_v54 = vstv %s1384_s24 }
  0xa4   : > { %v503_v44 = vadd.f32 %v502_v29, %v500_v36  ;;  %v552_v45 = vadd.f32 %v551_v32, %v549_v37  ;;  %v581_v55 = vstv %s1388_s23 }
  0xa5   : > { %v478_v47 = vmax.f32 %v477_v40, 0.0  ;;  %v529_v48 = vadd.f32 %v528_v35, %v526_v41  ;;  %v567_v52 = vstv %s1392_s29 }
  0xa6   : > { %v504_v51 = vmax.f32 %v503_v44, 0.0  ;;  %v555_v53 = vadd.f32 %v554_v38, %v552_v45  ;;  %v589_v61 = vstv %s1396_s8 }
  0xa7   : > { %v530_v39 = vmax.f32 %v529_v48, 0.0  ;;  %v558_v56 = vmul.f32 %v557_v42, %v478_v47  ;;  %v580_v57 = vmul.f32 %v579_v46, %v478_v47  ;;  %s374_s14 = sand.u32 1, %s1478_s10  }
  0xa8   : > { %v556_v58 = vmax.f32 %v555_v53, 0.0  ;;  %v562_v59 = vmul.f32 %v561_v43, %v504_v51  ;;  %v584_v60 = vmul.f32 %v583_v49, %v504_v51  ;;  %s796_s15 = sshll.u32 %s374_s14, 2  ;;  %p1480_p12 = scmp.ne.s32.totalorder %s1479_s27, 0 }
  0xa9   : > { %v560_v62 = vadd.f32 %v559_v54, %v558_v56  ;;  %v565_v63 = vmul.f32 %v564_v34, %v530_v39  ;;  %v582_v0 = vadd.f32 %v581_v55, %v580_v57  ;;  %v587_v1 = vmul.f32 %v586_v50, %v530_v39  ;;  %s376_s16 = scalar_lea.vmem [#allocation10], %s796_s15  ;;  %s1481_s13 = sld [smem:[#allocation16_spill]] (%p1480_p12) }
  0xaa   : > { %v568_v3 = vmul.f32 %v567_v52, %v556_v58  ;;  %v590_v5 = vmul.f32 %v589_v61, %v556_v58  ;;  %s1482_s18 = sld [smem:[#allocation27_spill]] (%p1480_p12) }
  0xab   : > { %v563_v2 = vadd.f32 %v562_v59, %v560_v62  ;;  %v585_v4 = vadd.f32 %v584_v60, %v582_v0 }
  0xad   : > { %v566_v6 = vadd.f32 %v565_v63, %v563_v2  ;;  %v588_v7 = vadd.f32 %v587_v1, %v585_v4 }
  0xaf   : > { %v569_v8 = vadd.f32 %v568_v3, %v566_v6  ;;  %v591_v9 = vadd.f32 %v590_v5, %v588_v7  ;;  %s848_s11 = sshll.u32 (%p1480_p12), %s1481_s13, 1 }
  0xb0   : > { %s608_s19 = scalar_lea.vmem (%p1480_p12), %s1482_s18, %s848_s11 }
  0xb1   : > { %v570_v10 = vmul.f32 0.5, %v569_v8  ;;  %v592_v11 = vmul.f32 0.5, %v591_v9 }
  0xb3   : > { %942 = vtanh.f32 %v570_v10 }
  0xb4   : > { %944 = vtanh.f32 %v592_v11 }
  0xc0   : > { %v943_v13 = vpop.eup %942 }
  0xc1   : > { %v945_v15 = vpop.eup %944  ;;  %v572_v16 = vmul.f32 0.5, %v943_v13 }
  0xc2   : > { %v594_v17 = vmul.f32 0.5, %v945_v15  ;;  %604 = sbr.rel (!%p1480_p12) target bundleno = 207 (0xcf), region = 72 }
  0xc3   : > { %v573_v18 = vadd.f32 0.5, %v572_v16 }
  0xc4   : > { %v595_v19 = vadd.f32 0.5, %v594_v17 }
  0xc5   : > { %578 = vst.msk [vmem:[%s376_s16] sm:$0x3] %vm576_vm0, %v573_v18 }
  0xc6   : > { %846 = vst.msk [vmem:[%s376_s16 + $0x2] sm:$0x3] %vm576_vm0, %v595_v19 }
  0xcc   : > { %v625_v20 = vld [vmem:[%s376_s16] sm:$0x3] }
  0xcd   : > { %v627_v14 = vld [vmem:[%s376_s16 + $0x2] sm:$0x3]  ;;  %626 = vst [vmem:[%s608_s19] sm:$0x3] %v625_v20 }
  0xce   : > { %628 = vst [vmem:[%s608_s19 + $0x4] sm:$0x3] %v627_v14 }
  0xcf PF: > { %s1483_s20 = sld [smem:[#allocation18_spill]] }
  0xd0   : > { %s1484_s24 = sld [smem:[#allocation15_spill]] }
  0xd1   : > { %s1485_s25 = sld [smem:[#allocation21_spill]] }
  0xd2   : > { %s1486_s26 = sld [smem:[#allocation17_spill]] }
  0xd3   : > { %s1487_s27 = sld [smem:[#allocation19_spill]] }
  0xd5   : > { %s20_s28 = sadd.s32 1, %s1483_s20  }
  0xd6   : > { %p17_p13 = scmp.ge.s32.totalorder %s20_s28, 4  }
  0xd8   :  { %19 = sbr.rel (!%p17_p13) target bundleno = 12 (0xc), region = 143 }
  0xdd   :  { %658 = vsyncpa [#allocation3], 1 }
  0xde   :  { %660 = vsyncpa [#allocation3 + $0x1], 1 }
  0xdf   :  { %661 = vsyncpa [#allocation5], 1 }
  0xe0   :  { %662 = vsyncpa [#allocation8], 1 }

</bundles_post_ra>
